<compile_context>
chip_gen: v7x
topology: tpu7x:2x2x1
jax: 0.10.0
libtpu: 0.0.40
codegen_flags: <defaults>
</compile_context>

<pallas_src>
import jax
import jax.numpy as jnp
import numpy as np
from jax.experimental import pallas as pl
from jax.experimental.pallas import tpu as pltpu

INPUT_SIZE = 1
HIDDEN = 32


def _make_lstm_chunk_kernel(tc, batch):
    """Kernel processing `tc` timesteps per grid step, carrying h/c in VMEM."""
    H = HIDDEN

    def kernel(x_ref, whh_ref, consts_ref, out_ref,
               h_scr, c_scr, pre_scr, out_scr):
        chunk = pl.program_id(0)

        # Zero initial hidden / cell state (hx=None in the PyTorch forward).
        @pl.when(chunk == 0)
        def _():
            h_scr[...] = jnp.zeros_like(h_scr)
            c_scr[...] = jnp.zeros_like(c_scr)

        # Constants (loaded once per chunk, broadcasts hoisted out of the loop).
        whh = whh_ref[...]                  # (H, 4H)  W_hh^T, g-cols pre-scaled x2
        wih = consts_ref[0:1, :]            # (1, 4H)  W_ih row, g-block pre-scaled x2
        bsum = consts_ref[1:2, :]           # (1, 4H)  b_ih + b_hh, g-block pre-scaled x2
        wout = consts_ref[2:3, 0:H]         # (1, H)   W_out row
        bout = consts_ref[3:4, 0:1]         # (1, 1)   b_out

        # Whole-chunk input projection (K=1 -> VPU broadcast-multiply), done once
        # per chunk and off the serial h->h chain.  Loop bodies just load a row.
        x4 = x_ref[0]                       # (TC, B, 1)
        pre_scr[...] = x4 * wih + bsum      # (TC, B, 4H)

        # Hoisted broadcast of the output-projection row.
        wout_b = jnp.broadcast_to(wout, (batch, H))   # (B, H)

        h = h_scr[...]                      # (B, H)
        c = c_scr[...]                      # (B, H)

        # Fully-unrolled recurrence over the chunk (static indices only).
        for t in range(tc):
            gates = pre_scr[t] + jnp.dot(h, whh,
                                         preferred_element_type=jnp.float32)  # (B, 4H)

            # Single full-lane EUP pass; g lanes were pre-scaled by 2 so
            # tanh(g) = 2*sigmoid(2g) - 1 reuses the same sigmoid result.
            # PyTorch gate order: i, f, g, o.
            sig = jax.nn.sigmoid(gates)
            i_g = sig[:, 0 * H:1 * H]
            f_g = sig[:, 1 * H:2 * H]
            g_g = 2.0 * sig[:, 2 * H:3 * H] - 1.0
            o_g = sig[:, 3 * H:4 * H]

            c = f_g * c + i_g * g_g
            h = o_g * jnp.tanh(c)

            # Linear(32 -> 1): VPU multiply + lane reduction (off the chain);
            # parked in VMEM scratch, written back densely after the loop.
            out_scr[:, t:t + 1] = jnp.sum(h * wout_b, axis=1, keepdims=True)

        # Carry the recurrent state to the next chunk.
        h_scr[...] = h
        c_scr[...] = c

        # Single dense (B, TC) store into the pipelined output tile; b_out
        # folded in here (one broadcast per chunk instead of per step).
        out_ref[0] = out_scr[...] + bout

    return kernel


def rnn_forward(x, params, time_chunk=128):
    """x: (B, T, INPUT_SIZE) float32, batch-first (as in the PyTorch module)."""
    B, T, _ = x.shape
    w_ih, w_hh, b_ih, b_hh, w_out, b_out = params
    H = HIDDEN

    TC = int(min(time_chunk, T))
    nc = -(-T // TC)                       # ceil(T / TC)
    T_pad = nc * TC

    # Pre-scale the g-gate block by 2 (wrapper-side, on copies) so the kernel
    # can recover tanh(g) from the single sigmoid pass: tanh(g)=2*sigmoid(2g)-1.
    gsc = jnp.ones((4 * H,), jnp.float32).at[2 * H:3 * H].set(2.0)
    wih_row = (w_ih.reshape(4 * H) * gsc).reshape(1, 4 * H)    # (1, 4H) INPUT_SIZE==1
    b_row = ((b_ih + b_hh) * gsc).reshape(1, 4 * H)            # (1, 4H)
    whh_t = w_hh.T * gsc[None, :]                              # (H, 4H)
    wout_row = w_out.reshape(1, H)                             # (1, H)

    # Pack the tiny constants into one (8, 4H) operand (single BlockSpec).
    consts = jnp.zeros((8, 4 * H), jnp.float32)
    consts = consts.at[0:1, :].set(wih_row)
    consts = consts.at[1:2, :].set(b_row)
    consts = consts.at[2:3, 0:H].set(wout_row)
    consts = consts.at[3, 0].set(b_out[0])

    # x chunked as (nc, TC, B, 1): leading-indexable per-timestep rows inside
    # the kernel so the whole-chunk input projection is a single broadcast
    # multiply and the unrolled loop only reads pre_scr[t].
    xf = x.reshape(B, T)
    if T_pad != T:
        xf = jnp.pad(xf, ((0, 0), (0, T_pad - T)))
    x_chunks = jnp.transpose(xf.reshape(B, nc, TC), (1, 2, 0))[..., None]  # (nc,TC,B,1)

    out_chunks = pl.pallas_call(
        _make_lstm_chunk_kernel(TC, B),
        out_shape=jax.ShapeDtypeStruct((nc, B, TC), jnp.float32),
        grid_spec=pltpu.PrefetchScalarGridSpec(
            num_scalar_prefetch=0,
            grid=(nc,),
            in_specs=[
                pl.BlockSpec((1, TC, B, 1), lambda c: (c, 0, 0, 0)),   # x chunk
                pl.BlockSpec((H, 4 * H), lambda c: (0, 0)),            # W_hh^T
                pl.BlockSpec((8, 4 * H), lambda c: (0, 0)),            # packed consts
            ],
            out_specs=pl.BlockSpec((1, B, TC), lambda c: (c, 0, 0)),
            scratch_shapes=[
                pltpu.VMEM((B, H), jnp.float32),            # h state (carried)
                pltpu.VMEM((B, H), jnp.float32),            # c state (carried)
                pltpu.VMEM((TC, B, 4 * H), jnp.float32),    # per-chunk input projection
                pltpu.VMEM((B, TC), jnp.float32),           # per-chunk outputs
            ],
        ),
        compiler_params=pltpu.CompilerParams(
            dimension_semantics=("arbitrary",)),            # sequential recurrence
    )(x_chunks, whh_t, consts)

    out = jnp.transpose(out_chunks, (1, 0, 2)).reshape(B, T_pad)[:, :T]
    return out.reshape(B, T, 1)


def init_params(key):
    """Deterministic init mimicking PyTorch's U(-1/sqrt(H), 1/sqrt(H))."""
    bound = 1.0 / np.sqrt(HIDDEN)
    ks = jax.random.split(key, 6)
    w_ih = jax.random.uniform(ks[0], (4 * HIDDEN, INPUT_SIZE), jnp.float32, -bound, bound)
    w_hh = jax.random.uniform(ks[1], (4 * HIDDEN, HIDDEN), jnp.float32, -bound, bound)
    b_ih = jax.random.uniform(ks[2], (4 * HIDDEN,), jnp.float32, -bound, bound)
    b_hh = jax.random.uniform(ks[3], (4 * HIDDEN,), jnp.float32, -bound, bound)
    w_out = jax.random.uniform(ks[4], (1, HIDDEN), jnp.float32, -bound, bound)
    b_out = jax.random.uniform(ks[5], (1,), jnp.float32, -bound, bound)
    return w_ih, w_hh, b_ih, b_hh, w_out, b_out


def rnn_forward_ref(x, params):
    """Pure-JAX reference (lax.scan LSTM) for correctness checking."""
    w_ih, w_hh, b_ih, b_hh, w_out, b_out = params
    B = x.shape[0]

    def step(carry, x_t):
        h, c = carry
        gates = x_t @ w_ih.T + h @ w_hh.T + b_ih + b_hh
        i_g, f_g, g_g, o_g = jnp.split(gates, 4, axis=-1)
        i_g, f_g, o_g = jax.nn.sigmoid(i_g), jax.nn.sigmoid(f_g), jax.nn.sigmoid(o_g)
        g_g = jnp.tanh(g_g)
        c_new = f_g * c + i_g * g_g
        h_new = o_g * jnp.tanh(c_new)
        return (h_new, c_new), h_new @ w_out.T + b_out

    init = (jnp.zeros((B, HIDDEN), jnp.float32), jnp.zeros((B, HIDDEN), jnp.float32))
    _, outs = jax.lax.scan(step, init, jnp.transpose(x, (1, 0, 2)))
    return jnp.transpose(outs, (1, 0, 2))


if __name__ == "__main__":
    key = jax.random.PRNGKey(0)
    k_param, k_x = jax.random.split(key)

    B, T = 2, 8
    params = init_params(k_param)
    x = jax.random.normal(k_x, (B, T, INPUT_SIZE), jnp.float32)

    out = rnn_forward(x, params)
    out = jax.block_until_ready(out)

    ref = jax.block_until_ready(rnn_forward_ref(x, params))
    assert out.shape == (B, T, 1)
    np.testing.assert_allclose(np.asarray(out), np.asarray(ref), rtol=1e-5, atol=1e-5)

    print("KERNEL_OK")
</pallas_src>

<mosaic_0001>
module attributes {stable_mosaic.version = 11 : i64} {
  func.func @kernel(%arg0: i32, %arg1: memref<1x8x2x1xf32, #tpu.memory_space<vmem>>, %arg2: memref<32x128xf32, #tpu.memory_space<vmem>>, %arg3: memref<8x128xf32, #tpu.memory_space<vmem>>, %arg4: memref<1x2x8xf32, #tpu.memory_space<vmem>>, %arg5: memref<2x32xf32, #tpu.memory_space<vmem>>, %arg6: memref<2x32xf32, #tpu.memory_space<vmem>>, %arg7: memref<8x2x128xf32, #tpu.memory_space<vmem>>, %arg8: memref<2x8xf32, #tpu.memory_space<vmem>>) attributes {dimension_semantics = [#tpu.dimension_semantics<arbitrary>], iteration_bounds = array<i64: 1>, scalar_prefetch = 0 : i64, scratch_operands = 4 : i64, tpu.core_type = #tpu.core_type<tc>, window_params = [{transform_indices = @transform_0, window_bounds = array<i64: 1, 8, 2, 1>}, {pipeline_mode = #tpu.pipeline_mode<synchronous>, transform_indices = @transform_1, window_bounds = array<i64: 32, 128>}, {pipeline_mode = #tpu.pipeline_mode<synchronous>, transform_indices = @transform_2, window_bounds = array<i64: 8, 128>}, {transform_indices = @transform_3, window_bounds = array<i64: 1, 2, 8>}]} {
    %c0_i32 = arith.constant 0 : i32
    %0 = arith.cmpi eq, %arg0, %c0_i32 : i32
    %1 = arith.extui %0 : i1 to i32
    %c0_i32_0 = arith.constant 0 : i32
    %2 = arith.cmpi ne, %1, %c0_i32_0 : i32
    scf.if %2 {
      %cst_102 = arith.constant 0.000000e+00 : f32
      %238 = vector.broadcast %cst_102 : f32 to vector<2x32xf32>
      %c0_103 = arith.constant 0 : index
      %c0_104 = arith.constant 0 : index
      %239 = vector.load %arg5[%c0_103, %c0_104] : memref<2x32xf32, #tpu.memory_space<vmem>>, vector<2x32xf32>
      tpu.vector_store %arg5[%c0_103, %c0_104], %238 {strides = array<i32>} : memref<2x32xf32, #tpu.memory_space<vmem>>, vector<2x32xf32>,
      %cst_105 = arith.constant 0.000000e+00 : f32
      %240 = vector.broadcast %cst_105 : f32 to vector<2x32xf32>
      %c0_106 = arith.constant 0 : index
      %c0_107 = arith.constant 0 : index
      %241 = vector.load %arg6[%c0_106, %c0_107] : memref<2x32xf32, #tpu.memory_space<vmem>>, vector<2x32xf32>
      tpu.vector_store %arg6[%c0_106, %c0_107], %240 {strides = array<i32>} : memref<2x32xf32, #tpu.memory_space<vmem>>, vector<2x32xf32>,
    } else {
    }
    %c0 = arith.constant 0 : index
    %c0_1 = arith.constant 0 : index
    %3 = vector.load %arg2[%c0, %c0_1] : memref<32x128xf32, #tpu.memory_space<vmem>>, vector<32x128xf32>
    %c0_2 = arith.constant 0 : index
    %c0_3 = arith.constant 0 : index
    %4 = vector.load %arg3[%c0_2, %c0_3] : memref<8x128xf32, #tpu.memory_space<vmem>>, vector<1x128xf32>
    %c1 = arith.constant 1 : index
    %c0_4 = arith.constant 0 : index
    %5 = vector.load %arg3[%c1, %c0_4] : memref<8x128xf32, #tpu.memory_space<vmem>>, vector<1x128xf32>
    %c2 = arith.constant 2 : index
    %c0_5 = arith.constant 0 : index
    %6 = vector.load %arg3[%c2, %c0_5] : memref<8x128xf32, #tpu.memory_space<vmem>>, vector<1x32xf32>
    %c3 = arith.constant 3 : index
    %c0_6 = arith.constant 0 : index
    %7 = vector.load %arg3[%c3, %c0_6] : memref<8x128xf32, #tpu.memory_space<vmem>>, vector<1x1xf32>
    %c0_7 = arith.constant 0 : index
    %c0_8 = arith.constant 0 : index
    %c0_9 = arith.constant 0 : index
    %c0_10 = arith.constant 0 : index
    %8 = vector.load %arg1[%c0_7, %c0_8, %c0_9, %c0_10] : memref<1x8x2x1xf32, #tpu.memory_space<vmem>>, vector<1x8x2x1xf32>
    %9 = vector.shape_cast %8 : vector<1x8x2x1xf32> to vector<8x2x1xf32>
    %10 = vector.shape_cast %4 : vector<1x128xf32> to vector<1x1x128xf32>
    %11 = vector.broadcast %9 : vector<8x2x1xf32> to vector<8x2x128xf32>
    %12 = vector.broadcast %10 : vector<1x1x128xf32> to vector<8x2x128xf32>
    %13 = arith.mulf %11, %12 : vector<8x2x128xf32>
    %14 = vector.shape_cast %5 : vector<1x128xf32> to vector<1x1x128xf32>
    %15 = vector.broadcast %14 : vector<1x1x128xf32> to vector<8x2x128xf32>
    %16 = arith.addf %13, %15 : vector<8x2x128xf32>
    %c0_11 = arith.constant 0 : index
    %c0_12 = arith.constant 0 : index
    %c0_13 = arith.constant 0 : index
    %17 = vector.load %arg7[%c0_11, %c0_12, %c0_13] : memref<8x2x128xf32, #tpu.memory_space<vmem>>, vector<8x2x128xf32>
    tpu.vector_store %arg7[%c0_11, %c0_12, %c0_13], %16 {strides = array<i32>} : memref<8x2x128xf32, #tpu.memory_space<vmem>>, vector<8x2x128xf32>,
    %18 = vector.shape_cast %6 : vector<1x32xf32> to vector<1x32xf32>
    %19 = vector.broadcast %18 : vector<1x32xf32> to vector<2x32xf32>
    %c0_14 = arith.constant 0 : index
    %c0_15 = arith.constant 0 : index
    %20 = vector.load %arg5[%c0_14, %c0_15] : memref<2x32xf32, #tpu.memory_space<vmem>>, vector<2x32xf32>
    %c0_16 = arith.constant 0 : index
    %c0_17 = arith.constant 0 : index
    %21 = vector.load %arg6[%c0_16, %c0_17] : memref<2x32xf32, #tpu.memory_space<vmem>>, vector<2x32xf32>
    %c0_18 = arith.constant 0 : index
    %c0_19 = arith.constant 0 : index
    %c0_20 = arith.constant 0 : index
    %22 = vector.load %arg7[%c0_18, %c0_19, %c0_20] : memref<8x2x128xf32, #tpu.memory_space<vmem>>, vector<1x2x128xf32>
    %23 = vector.shape_cast %22 : vector<1x2x128xf32> to vector<2x128xf32>
    %cst = arith.constant dense<0.000000e+00> : vector<2x128xf32>
    %24 = tpu.matmul %20, %3, %cst {dimension_numbers = #tpu.dot_dimension_numbers<[1], [0], [0], [1], [0, 0, 1, 1], [], []>} : vector<2x32xf32>, vector<32x128xf32>, vector<2x128xf32> -> vector<2x128xf32>
    %25 = arith.addf %23, %24 : vector<2x128xf32>
    %26 = arith.negf %25 : vector<2x128xf32>
    %27 = math.exp %26 : vector<2x128xf32>
    %cst_21 = arith.constant 1.000000e+00 : f32
    %28 = vector.broadcast %cst_21 : f32 to vector<2x128xf32>
    %29 = arith.addf %28, %27 : vector<2x128xf32>
    %30 = arith.divf %28, %29 : vector<2x128xf32>
    %31 = vector.extract_strided_slice %30 {offsets = [0, 0], sizes = [2, 32], strides = [1, 1]} : vector<2x128xf32> to vector<2x32xf32>
    %32 = vector.extract_strided_slice %30 {offsets = [0, 32], sizes = [2, 32], strides = [1, 1]} : vector<2x128xf32> to vector<2x32xf32>
    %33 = vector.extract_strided_slice %30 {offsets = [0, 64], sizes = [2, 32], strides = [1, 1]} : vector<2x128xf32> to vector<2x32xf32>
    %cst_22 = arith.constant 2.000000e+00 : f32
    %34 = vector.broadcast %cst_22 : f32 to vector<2x32xf32>
    %35 = arith.mulf %34, %33 : vector<2x32xf32>
    %cst_23 = arith.constant 1.000000e+00 : f32
    %36 = vector.broadcast %cst_23 : f32 to vector<2x32xf32>
    %37 = arith.subf %35, %36 : vector<2x32xf32>
    %38 = vector.extract_strided_slice %30 {offsets = [0, 96], sizes = [2, 32], strides = [1, 1]} : vector<2x128xf32> to vector<2x32xf32>
    %39 = arith.mulf %32, %21 : vector<2x32xf32>
    %40 = arith.mulf %31, %37 : vector<2x32xf32>
    %41 = arith.addf %39, %40 : vector<2x32xf32>
    %42 = math.tanh %41 : vector<2x32xf32>
    %43 = arith.mulf %38, %42 : vector<2x32xf32>
    %44 = arith.mulf %43, %19 : vector<2x32xf32>
    %cst_24 = arith.constant dense<0.000000e+00> : vector<2xf32>
    %45 = vector.multi_reduction <add>, %44, %cst_24 [1] : vector<2x32xf32> to vector<2xf32>
    %46 = vector.shape_cast %45 : vector<2xf32> to vector<2x1xf32>
    %c0_25 = arith.constant 0 : index
    %c0_26 = arith.constant 0 : index
    %47 = vector.load %arg8[%c0_25, %c0_26] : memref<2x8xf32, #tpu.memory_space<vmem>>, vector<2x1xf32>
    tpu.vector_store %arg8[%c0_25, %c0_26], %46 {strides = array<i32>} : memref<2x8xf32, #tpu.memory_space<vmem>>, vector<2x1xf32>,
    %c1_27 = arith.constant 1 : index
    %c0_28 = arith.constant 0 : index
    %c0_29 = arith.constant 0 : index
    %48 = vector.load %arg7[%c1_27, %c0_28, %c0_29] : memref<8x2x128xf32, #tpu.memory_space<vmem>>, vector<1x2x128xf32>
    %49 = vector.shape_cast %48 : vector<1x2x128xf32> to vector<2x128xf32>
    %cst_30 = arith.constant dense<0.000000e+00> : vector<2x128xf32>
    %50 = tpu.matmul %43, %3, %cst_30 {dimension_numbers = #tpu.dot_dimension_numbers<[1], [0], [0], [1], [0, 0, 1, 1], [], []>} : vector<2x32xf32>, vector<32x128xf32>, vector<2x128xf32> -> vector<2x128xf32>
    %51 = arith.addf %49, %50 : vector<2x128xf32>
    %52 = arith.negf %51 : vector<2x128xf32>
    %53 = math.exp %52 : vector<2x128xf32>
    %cst_31 = arith.constant 1.000000e+00 : f32
    %54 = vector.broadcast %cst_31 : f32 to vector<2x128xf32>
    %55 = arith.addf %54, %53 : vector<2x128xf32>
    %56 = arith.divf %54, %55 : vector<2x128xf32>
    %57 = vector.extract_strided_slice %56 {offsets = [0, 0], sizes = [2, 32], strides = [1, 1]} : vector<2x128xf32> to vector<2x32xf32>
    %58 = vector.extract_strided_slice %56 {offsets = [0, 32], sizes = [2, 32], strides = [1, 1]} : vector<2x128xf32> to vector<2x32xf32>
    %59 = vector.extract_strided_slice %56 {offsets = [0, 64], sizes = [2, 32], strides = [1, 1]} : vector<2x128xf32> to vector<2x32xf32>
    %cst_32 = arith.constant 2.000000e+00 : f32
    %60 = vector.broadcast %cst_32 : f32 to vector<2x32xf32>
    %61 = arith.mulf %60, %59 : vector<2x32xf32>
    %cst_33 = arith.constant 1.000000e+00 : f32
    %62 = vector.broadcast %cst_33 : f32 to vector<2x32xf32>
    %63 = arith.subf %61, %62 : vector<2x32xf32>
    %64 = vector.extract_strided_slice %56 {offsets = [0, 96], sizes = [2, 32], strides = [1, 1]} : vector<2x128xf32> to vector<2x32xf32>
    %65 = arith.mulf %58, %41 : vector<2x32xf32>
    %66 = arith.mulf %57, %63 : vector<2x32xf32>
    %67 = arith.addf %65, %66 : vector<2x32xf32>
    %68 = math.tanh %67 : vector<2x32xf32>
    %69 = arith.mulf %64, %68 : vector<2x32xf32>
    %70 = arith.mulf %69, %19 : vector<2x32xf32>
    %cst_34 = arith.constant dense<0.000000e+00> : vector<2xf32>
    %71 = vector.multi_reduction <add>, %70, %cst_34 [1] : vector<2x32xf32> to vector<2xf32>
    %72 = vector.shape_cast %71 : vector<2xf32> to vector<2x1xf32>
    %c0_35 = arith.constant 0 : index
    %c1_36 = arith.constant 1 : index
    %73 = vector.load %arg8[%c0_35, %c1_36] : memref<2x8xf32, #tpu.memory_space<vmem>>, vector<2x1xf32>
    tpu.vector_store %arg8[%c0_35, %c1_36], %72 {strides = array<i32>} : memref<2x8xf32, #tpu.memory_space<vmem>>, vector<2x1xf32>,
    %c2_37 = arith.constant 2 : index
    %c0_38 = arith.constant 0 : index
    %c0_39 = arith.constant 0 : index
    %74 = vector.load %arg7[%c2_37, %c0_38, %c0_39] : memref<8x2x128xf32, #tpu.memory_space<vmem>>, vector<1x2x128xf32>
    %75 = vector.shape_cast %74 : vector<1x2x128xf32> to vector<2x128xf32>
    %cst_40 = arith.constant dense<0.000000e+00> : vector<2x128xf32>
    %76 = tpu.matmul %69, %3, %cst_40 {dimension_numbers = #tpu.dot_dimension_numbers<[1], [0], [0], [1], [0, 0, 1, 1], [], []>} : vector<2x32xf32>, vector<32x128xf32>, vector<2x128xf32> -> vector<2x128xf32>
    %77 = arith.addf %75, %76 : vector<2x128xf32>
    %78 = arith.negf %77 : vector<2x128xf32>
    %79 = math.exp %78 : vector<2x128xf32>
    %cst_41 = arith.constant 1.000000e+00 : f32
    %80 = vector.broadcast %cst_41 : f32 to vector<2x128xf32>
    %81 = arith.addf %80, %79 : vector<2x128xf32>
    %82 = arith.divf %80, %81 : vector<2x128xf32>
    %83 = vector.extract_strided_slice %82 {offsets = [0, 0], sizes = [2, 32], strides = [1, 1]} : vector<2x128xf32> to vector<2x32xf32>
    %84 = vector.extract_strided_slice %82 {offsets = [0, 32], sizes = [2, 32], strides = [1, 1]} : vector<2x128xf32> to vector<2x32xf32>
    %85 = vector.extract_strided_slice %82 {offsets = [0, 64], sizes = [2, 32], strides = [1, 1]} : vector<2x128xf32> to vector<2x32xf32>
    %cst_42 = arith.constant 2.000000e+00 : f32
    %86 = vector.broadcast %cst_42 : f32 to vector<2x32xf32>
    %87 = arith.mulf %86, %85 : vector<2x32xf32>
    %cst_43 = arith.constant 1.000000e+00 : f32
    %88 = vector.broadcast %cst_43 : f32 to vector<2x32xf32>
    %89 = arith.subf %87, %88 : vector<2x32xf32>
    %90 = vector.extract_strided_slice %82 {offsets = [0, 96], sizes = [2, 32], strides = [1, 1]} : vector<2x128xf32> to vector<2x32xf32>
    %91 = arith.mulf %84, %67 : vector<2x32xf32>
    %92 = arith.mulf %83, %89 : vector<2x32xf32>
    %93 = arith.addf %91, %92 : vector<2x32xf32>
    %94 = math.tanh %93 : vector<2x32xf32>
    %95 = arith.mulf %90, %94 : vector<2x32xf32>
    %96 = arith.mulf %95, %19 : vector<2x32xf32>
    %cst_44 = arith.constant dense<0.000000e+00> : vector<2xf32>
    %97 = vector.multi_reduction <add>, %96, %cst_44 [1] : vector<2x32xf32> to vector<2xf32>
    %98 = vector.shape_cast %97 : vector<2xf32> to vector<2x1xf32>
    %c0_45 = arith.constant 0 : index
    %c2_46 = arith.constant 2 : index
    %99 = vector.load %arg8[%c0_45, %c2_46] : memref<2x8xf32, #tpu.memory_space<vmem>>, vector<2x1xf32>
    tpu.vector_store %arg8[%c0_45, %c2_46], %98 {strides = array<i32>} : memref<2x8xf32, #tpu.memory_space<vmem>>, vector<2x1xf32>,
    %c3_47 = arith.constant 3 : index
    %c0_48 = arith.constant 0 : index
    %c0_49 = arith.constant 0 : index
    %100 = vector.load %arg7[%c3_47, %c0_48, %c0_49] : memref<8x2x128xf32, #tpu.memory_space<vmem>>, vector<1x2x128xf32>
    %101 = vector.shape_cast %100 : vector<1x2x128xf32> to vector<2x128xf32>
    %cst_50 = arith.constant dense<0.000000e+00> : vector<2x128xf32>
    %102 = tpu.matmul %95, %3, %cst_50 {dimension_numbers = #tpu.dot_dimension_numbers<[1], [0], [0], [1], [0, 0, 1, 1], [], []>} : vector<2x32xf32>, vector<32x128xf32>, vector<2x128xf32> -> vector<2x128xf32>
    %103 = arith.addf %101, %102 : vector<2x128xf32>
    %104 = arith.negf %103 : vector<2x128xf32>
    %105 = math.exp %104 : vector<2x128xf32>
    %cst_51 = arith.constant 1.000000e+00 : f32
    %106 = vector.broadcast %cst_51 : f32 to vector<2x128xf32>
    %107 = arith.addf %106, %105 : vector<2x128xf32>
    %108 = arith.divf %106, %107 : vector<2x128xf32>
    %109 = vector.extract_strided_slice %108 {offsets = [0, 0], sizes = [2, 32], strides = [1, 1]} : vector<2x128xf32> to vector<2x32xf32>
    %110 = vector.extract_strided_slice %108 {offsets = [0, 32], sizes = [2, 32], strides = [1, 1]} : vector<2x128xf32> to vector<2x32xf32>
    %111 = vector.extract_strided_slice %108 {offsets = [0, 64], sizes = [2, 32], strides = [1, 1]} : vector<2x128xf32> to vector<2x32xf32>
    %cst_52 = arith.constant 2.000000e+00 : f32
    %112 = vector.broadcast %cst_52 : f32 to vector<2x32xf32>
    %113 = arith.mulf %112, %111 : vector<2x32xf32>
    %cst_53 = arith.constant 1.000000e+00 : f32
    %114 = vector.broadcast %cst_53 : f32 to vector<2x32xf32>
    %115 = arith.subf %113, %114 : vector<2x32xf32>
    %116 = vector.extract_strided_slice %108 {offsets = [0, 96], sizes = [2, 32], strides = [1, 1]} : vector<2x128xf32> to vector<2x32xf32>
    %117 = arith.mulf %110, %93 : vector<2x32xf32>
    %118 = arith.mulf %109, %115 : vector<2x32xf32>
    %119 = arith.addf %117, %118 : vector<2x32xf32>
    %120 = math.tanh %119 : vector<2x32xf32>
    %121 = arith.mulf %116, %120 : vector<2x32xf32>
    %122 = arith.mulf %121, %19 : vector<2x32xf32>
    %cst_54 = arith.constant dense<0.000000e+00> : vector<2xf32>
    %123 = vector.multi_reduction <add>, %122, %cst_54 [1] : vector<2x32xf32> to vector<2xf32>
    %124 = vector.shape_cast %123 : vector<2xf32> to vector<2x1xf32>
    %c0_55 = arith.constant 0 : index
    %c3_56 = arith.constant 3 : index
    %125 = vector.load %arg8[%c0_55, %c3_56] : memref<2x8xf32, #tpu.memory_space<vmem>>, vector<2x1xf32>
    tpu.vector_store %arg8[%c0_55, %c3_56], %124 {strides = array<i32>} : memref<2x8xf32, #tpu.memory_space<vmem>>, vector<2x1xf32>,
    %c4 = arith.constant 4 : index
    %c0_57 = arith.constant 0 : index
    %c0_58 = arith.constant 0 : index
    %126 = vector.load %arg7[%c4, %c0_57, %c0_58] : memref<8x2x128xf32, #tpu.memory_space<vmem>>, vector<1x2x128xf32>
    %127 = vector.shape_cast %126 : vector<1x2x128xf32> to vector<2x128xf32>
    %cst_59 = arith.constant dense<0.000000e+00> : vector<2x128xf32>
    %128 = tpu.matmul %121, %3, %cst_59 {dimension_numbers = #tpu.dot_dimension_numbers<[1], [0], [0], [1], [0, 0, 1, 1], [], []>} : vector<2x32xf32>, vector<32x128xf32>, vector<2x128xf32> -> vector<2x128xf32>
    %129 = arith.addf %127, %128 : vector<2x128xf32>
    %130 = arith.negf %129 : vector<2x128xf32>
    %131 = math.exp %130 : vector<2x128xf32>
    %cst_60 = arith.constant 1.000000e+00 : f32
    %132 = vector.broadcast %cst_60 : f32 to vector<2x128xf32>
    %133 = arith.addf %132, %131 : vector<2x128xf32>
    %134 = arith.divf %132, %133 : vector<2x128xf32>
    %135 = vector.extract_strided_slice %134 {offsets = [0, 0], sizes = [2, 32], strides = [1, 1]} : vector<2x128xf32> to vector<2x32xf32>
    %136 = vector.extract_strided_slice %134 {offsets = [0, 32], sizes = [2, 32], strides = [1, 1]} : vector<2x128xf32> to vector<2x32xf32>
    %137 = vector.extract_strided_slice %134 {offsets = [0, 64], sizes = [2, 32], strides = [1, 1]} : vector<2x128xf32> to vector<2x32xf32>
    %cst_61 = arith.constant 2.000000e+00 : f32
    %138 = vector.broadcast %cst_61 : f32 to vector<2x32xf32>
    %139 = arith.mulf %138, %137 : vector<2x32xf32>
    %cst_62 = arith.constant 1.000000e+00 : f32
    %140 = vector.broadcast %cst_62 : f32 to vector<2x32xf32>
    %141 = arith.subf %139, %140 : vector<2x32xf32>
    %142 = vector.extract_strided_slice %134 {offsets = [0, 96], sizes = [2, 32], strides = [1, 1]} : vector<2x128xf32> to vector<2x32xf32>
    %143 = arith.mulf %136, %119 : vector<2x32xf32>
    %144 = arith.mulf %135, %141 : vector<2x32xf32>
    %145 = arith.addf %143, %144 : vector<2x32xf32>
    %146 = math.tanh %145 : vector<2x32xf32>
    %147 = arith.mulf %142, %146 : vector<2x32xf32>
    %148 = arith.mulf %147, %19 : vector<2x32xf32>
    %cst_63 = arith.constant dense<0.000000e+00> : vector<2xf32>
    %149 = vector.multi_reduction <add>, %148, %cst_63 [1] : vector<2x32xf32> to vector<2xf32>
    %150 = vector.shape_cast %149 : vector<2xf32> to vector<2x1xf32>
    %c0_64 = arith.constant 0 : index
    %c4_65 = arith.constant 4 : index
    %151 = vector.load %arg8[%c0_64, %c4_65] : memref<2x8xf32, #tpu.memory_space<vmem>>, vector<2x1xf32>
    tpu.vector_store %arg8[%c0_64, %c4_65], %150 {strides = array<i32>} : memref<2x8xf32, #tpu.memory_space<vmem>>, vector<2x1xf32>,
    %c5 = arith.constant 5 : index
    %c0_66 = arith.constant 0 : index
    %c0_67 = arith.constant 0 : index
    %152 = vector.load %arg7[%c5, %c0_66, %c0_67] : memref<8x2x128xf32, #tpu.memory_space<vmem>>, vector<1x2x128xf32>
    %153 = vector.shape_cast %152 : vector<1x2x128xf32> to vector<2x128xf32>
    %cst_68 = arith.constant dense<0.000000e+00> : vector<2x128xf32>
    %154 = tpu.matmul %147, %3, %cst_68 {dimension_numbers = #tpu.dot_dimension_numbers<[1], [0], [0], [1], [0, 0, 1, 1], [], []>} : vector<2x32xf32>, vector<32x128xf32>, vector<2x128xf32> -> vector<2x128xf32>
    %155 = arith.addf %153, %154 : vector<2x128xf32>
    %156 = arith.negf %155 : vector<2x128xf32>
    %157 = math.exp %156 : vector<2x128xf32>
    %cst_69 = arith.constant 1.000000e+00 : f32
    %158 = vector.broadcast %cst_69 : f32 to vector<2x128xf32>
    %159 = arith.addf %158, %157 : vector<2x128xf32>
    %160 = arith.divf %158, %159 : vector<2x128xf32>
    %161 = vector.extract_strided_slice %160 {offsets = [0, 0], sizes = [2, 32], strides = [1, 1]} : vector<2x128xf32> to vector<2x32xf32>
    %162 = vector.extract_strided_slice %160 {offsets = [0, 32], sizes = [2, 32], strides = [1, 1]} : vector<2x128xf32> to vector<2x32xf32>
    %163 = vector.extract_strided_slice %160 {offsets = [0, 64], sizes = [2, 32], strides = [1, 1]} : vector<2x128xf32> to vector<2x32xf32>
    %cst_70 = arith.constant 2.000000e+00 : f32
    %164 = vector.broadcast %cst_70 : f32 to vector<2x32xf32>
    %165 = arith.mulf %164, %163 : vector<2x32xf32>
    %cst_71 = arith.constant 1.000000e+00 : f32
    %166 = vector.broadcast %cst_71 : f32 to vector<2x32xf32>
    %167 = arith.subf %165, %166 : vector<2x32xf32>
    %168 = vector.extract_strided_slice %160 {offsets = [0, 96], sizes = [2, 32], strides = [1, 1]} : vector<2x128xf32> to vector<2x32xf32>
    %169 = arith.mulf %162, %145 : vector<2x32xf32>
    %170 = arith.mulf %161, %167 : vector<2x32xf32>
    %171 = arith.addf %169, %170 : vector<2x32xf32>
    %172 = math.tanh %171 : vector<2x32xf32>
    %173 = arith.mulf %168, %172 : vector<2x32xf32>
    %174 = arith.mulf %173, %19 : vector<2x32xf32>
    %cst_72 = arith.constant dense<0.000000e+00> : vector<2xf32>
    %175 = vector.multi_reduction <add>, %174, %cst_72 [1] : vector<2x32xf32> to vector<2xf32>
    %176 = vector.shape_cast %175 : vector<2xf32> to vector<2x1xf32>
    %c0_73 = arith.constant 0 : index
    %c5_74 = arith.constant 5 : index
    %177 = vector.load %arg8[%c0_73, %c5_74] : memref<2x8xf32, #tpu.memory_space<vmem>>, vector<2x1xf32>
    tpu.vector_store %arg8[%c0_73, %c5_74], %176 {strides = array<i32>} : memref<2x8xf32, #tpu.memory_space<vmem>>, vector<2x1xf32>,
    %c6 = arith.constant 6 : index
    %c0_75 = arith.constant 0 : index
    %c0_76 = arith.constant 0 : index
    %178 = vector.load %arg7[%c6, %c0_75, %c0_76] : memref<8x2x128xf32, #tpu.memory_space<vmem>>, vector<1x2x128xf32>
    %179 = vector.shape_cast %178 : vector<1x2x128xf32> to vector<2x128xf32>
    %cst_77 = arith.constant dense<0.000000e+00> : vector<2x128xf32>
    %180 = tpu.matmul %173, %3, %cst_77 {dimension_numbers = #tpu.dot_dimension_numbers<[1], [0], [0], [1], [0, 0, 1, 1], [], []>} : vector<2x32xf32>, vector<32x128xf32>, vector<2x128xf32> -> vector<2x128xf32>
    %181 = arith.addf %179, %180 : vector<2x128xf32>
    %182 = arith.negf %181 : vector<2x128xf32>
    %183 = math.exp %182 : vector<2x128xf32>
    %cst_78 = arith.constant 1.000000e+00 : f32
    %184 = vector.broadcast %cst_78 : f32 to vector<2x128xf32>
    %185 = arith.addf %184, %183 : vector<2x128xf32>
    %186 = arith.divf %184, %185 : vector<2x128xf32>
    %187 = vector.extract_strided_slice %186 {offsets = [0, 0], sizes = [2, 32], strides = [1, 1]} : vector<2x128xf32> to vector<2x32xf32>
    %188 = vector.extract_strided_slice %186 {offsets = [0, 32], sizes = [2, 32], strides = [1, 1]} : vector<2x128xf32> to vector<2x32xf32>
    %189 = vector.extract_strided_slice %186 {offsets = [0, 64], sizes = [2, 32], strides = [1, 1]} : vector<2x128xf32> to vector<2x32xf32>
    %cst_79 = arith.constant 2.000000e+00 : f32
    %190 = vector.broadcast %cst_79 : f32 to vector<2x32xf32>
    %191 = arith.mulf %190, %189 : vector<2x32xf32>
    %cst_80 = arith.constant 1.000000e+00 : f32
    %192 = vector.broadcast %cst_80 : f32 to vector<2x32xf32>
    %193 = arith.subf %191, %192 : vector<2x32xf32>
    %194 = vector.extract_strided_slice %186 {offsets = [0, 96], sizes = [2, 32], strides = [1, 1]} : vector<2x128xf32> to vector<2x32xf32>
    %195 = arith.mulf %188, %171 : vector<2x32xf32>
    %196 = arith.mulf %187, %193 : vector<2x32xf32>
    %197 = arith.addf %195, %196 : vector<2x32xf32>
    %198 = math.tanh %197 : vector<2x32xf32>
    %199 = arith.mulf %194, %198 : vector<2x32xf32>
    %200 = arith.mulf %199, %19 : vector<2x32xf32>
    %cst_81 = arith.constant dense<0.000000e+00> : vector<2xf32>
    %201 = vector.multi_reduction <add>, %200, %cst_81 [1] : vector<2x32xf32> to vector<2xf32>
    %202 = vector.shape_cast %201 : vector<2xf32> to vector<2x1xf32>
    %c0_82 = arith.constant 0 : index
    %c6_83 = arith.constant 6 : index
    %203 = vector.load %arg8[%c0_82, %c6_83] : memref<2x8xf32, #tpu.memory_space<vmem>>, vector<2x1xf32>
    tpu.vector_store %arg8[%c0_82, %c6_83], %202 {strides = array<i32>} : memref<2x8xf32, #tpu.memory_space<vmem>>, vector<2x1xf32>,
    %c7 = arith.constant 7 : index
    %c0_84 = arith.constant 0 : index
    %c0_85 = arith.constant 0 : index
    %204 = vector.load %arg7[%c7, %c0_84, %c0_85] : memref<8x2x128xf32, #tpu.memory_space<vmem>>, vector<1x2x128xf32>
    %205 = vector.shape_cast %204 : vector<1x2x128xf32> to vector<2x128xf32>
    %cst_86 = arith.constant dense<0.000000e+00> : vector<2x128xf32>
    %206 = tpu.matmul %199, %3, %cst_86 {dimension_numbers = #tpu.dot_dimension_numbers<[1], [0], [0], [1], [0, 0, 1, 1], [], []>} : vector<2x32xf32>, vector<32x128xf32>, vector<2x128xf32> -> vector<2x128xf32>
    %207 = arith.addf %205, %206 : vector<2x128xf32>
    %208 = arith.negf %207 : vector<2x128xf32>
    %209 = math.exp %208 : vector<2x128xf32>
    %cst_87 = arith.constant 1.000000e+00 : f32
    %210 = vector.broadcast %cst_87 : f32 to vector<2x128xf32>
    %211 = arith.addf %210, %209 : vector<2x128xf32>
    %212 = arith.divf %210, %211 : vector<2x128xf32>
    %213 = vector.extract_strided_slice %212 {offsets = [0, 0], sizes = [2, 32], strides = [1, 1]} : vector<2x128xf32> to vector<2x32xf32>
    %214 = vector.extract_strided_slice %212 {offsets = [0, 32], sizes = [2, 32], strides = [1, 1]} : vector<2x128xf32> to vector<2x32xf32>
    %215 = vector.extract_strided_slice %212 {offsets = [0, 64], sizes = [2, 32], strides = [1, 1]} : vector<2x128xf32> to vector<2x32xf32>
    %cst_88 = arith.constant 2.000000e+00 : f32
    %216 = vector.broadcast %cst_88 : f32 to vector<2x32xf32>
    %217 = arith.mulf %216, %215 : vector<2x32xf32>
    %cst_89 = arith.constant 1.000000e+00 : f32
    %218 = vector.broadcast %cst_89 : f32 to vector<2x32xf32>
    %219 = arith.subf %217, %218 : vector<2x32xf32>
    %220 = vector.extract_strided_slice %212 {offsets = [0, 96], sizes = [2, 32], strides = [1, 1]} : vector<2x128xf32> to vector<2x32xf32>
    %221 = arith.mulf %214, %197 : vector<2x32xf32>
    %222 = arith.mulf %213, %219 : vector<2x32xf32>
    %223 = arith.addf %221, %222 : vector<2x32xf32>
    %224 = math.tanh %223 : vector<2x32xf32>
    %225 = arith.mulf %220, %224 : vector<2x32xf32>
    %226 = arith.mulf %225, %19 : vector<2x32xf32>
    %cst_90 = arith.constant dense<0.000000e+00> : vector<2xf32>
    %227 = vector.multi_reduction <add>, %226, %cst_90 [1] : vector<2x32xf32> to vector<2xf32>
    %228 = vector.shape_cast %227 : vector<2xf32> to vector<2x1xf32>
    %c0_91 = arith.constant 0 : index
    %c7_92 = arith.constant 7 : index
    %229 = vector.load %arg8[%c0_91, %c7_92] : memref<2x8xf32, #tpu.memory_space<vmem>>, vector<2x1xf32>
    tpu.vector_store %arg8[%c0_91, %c7_92], %228 {strides = array<i32>} : memref<2x8xf32, #tpu.memory_space<vmem>>, vector<2x1xf32>,
    %c0_93 = arith.constant 0 : index
    %c0_94 = arith.constant 0 : index
    %230 = vector.load %arg5[%c0_93, %c0_94] : memref<2x32xf32, #tpu.memory_space<vmem>>, vector<2x32xf32>
    tpu.vector_store %arg5[%c0_93, %c0_94], %225 {strides = array<i32>} : memref<2x32xf32, #tpu.memory_space<vmem>>, vector<2x32xf32>,
    %c0_95 = arith.constant 0 : index
    %c0_96 = arith.constant 0 : index
    %231 = vector.load %arg6[%c0_95, %c0_96] : memref<2x32xf32, #tpu.memory_space<vmem>>, vector<2x32xf32>
    tpu.vector_store %arg6[%c0_95, %c0_96], %223 {strides = array<i32>} : memref<2x32xf32, #tpu.memory_space<vmem>>, vector<2x32xf32>,
    %c0_97 = arith.constant 0 : index
    %c0_98 = arith.constant 0 : index
    %232 = vector.load %arg8[%c0_97, %c0_98] : memref<2x8xf32, #tpu.memory_space<vmem>>, vector<2x8xf32>
    %233 = vector.broadcast %7 : vector<1x1xf32> to vector<2x8xf32>
    %234 = arith.addf %232, %233 : vector<2x8xf32>
    %c0_99 = arith.constant 0 : index
    %c0_100 = arith.constant 0 : index
    %c0_101 = arith.constant 0 : index
    %235 = vector.load %arg4[%c0_99, %c0_100, %c0_101] : memref<1x2x8xf32, #tpu.memory_space<vmem>>, vector<1x2x8xf32>
    %236 = vector.shape_cast %235 : vector<1x2x8xf32> to vector<2x8xf32>
    %237 = vector.shape_cast %234 : vector<2x8xf32> to vector<1x2x8xf32>
    tpu.vector_store %arg4[%c0_99, %c0_100, %c0_101], %237 {strides = array<i32>} : memref<1x2x8xf32, #tpu.memory_space<vmem>>, vector<1x2x8xf32>,
    return
  }
  func.func @transform_0(%arg0: i32) -> (i32, i32, i32, i32) {
    %c0_i32 = arith.constant 0 : i32
    %c0_i32_0 = arith.constant 0 : i32
    %c0_i32_1 = arith.constant 0 : i32
    %c0_i32_2 = arith.constant 0 : i32
    return %arg0, %c0_i32, %c0_i32_0, %c0_i32_1 : i32, i32, i32, i32
  }
  func.func @transform_1(%arg0: i32) -> (i32, i32) {
    %c0_i32 = arith.constant 0 : i32
    %c0_i32_0 = arith.constant 0 : i32
    %c0_i32_1 = arith.constant 0 : i32
    return %c0_i32, %c0_i32_0 : i32, i32
  }
  func.func @transform_2(%arg0: i32) -> (i32, i32) {
    %c0_i32 = arith.constant 0 : i32
    %c0_i32_0 = arith.constant 0 : i32
    %c0_i32_1 = arith.constant 0 : i32
    return %c0_i32, %c0_i32_0 : i32, i32
  }
  func.func @transform_3(%arg0: i32) -> (i32, i32, i32) {
    %c0_i32 = arith.constant 0 : i32
    %c0_i32_0 = arith.constant 0 : i32
    %c0_i32_1 = arith.constant 0 : i32
    return %arg0, %c0_i32, %c0_i32_0 : i32, i32, i32
  }
}

</mosaic_0001>

<bundles_post_ra>
// kernel: tpu_custom_call.1
= control target key start
LH: loop header
LB: loop body
LE: loop exit
PB: predicated region body
PF: predicated region fallthrough
CT: control target
= control target key end

     0   :  { %8 = vsyncpa [#allocation7], 0  ;;  %s1640_s0 = inlined_call_operand.vmem [shape: f32[1,8,2,1], index: 0, kind: input, shape index: {}]   ;;  %s1641_s1 = inlined_call_operand.hbm [shape: f32[32,128], index: 1, kind: input, shape index: {}]   ;;  %s1642_s2 = inlined_call_operand.vmem [shape: f32[8,128], index: 2, kind: input, shape index: {}]   ;;  %s1643_s3 = inlined_call_operand.hbm [shape: f32[1,2,8], index: 3, kind: output, shape index: {}]  }
   0x1   :  { %9 = vsyncpa [#allocation8], 0  ;;  %s1388_s12 = smov [#allocation6]   ;;  %s1340_s16 = scalar_lea.hbm %s1641_s1, 512 }
   0x2   :  { %s17_s13 = sshll.u32 %s1388_s12, 4  ;;  %p1341_p0 = scmp.ne.s32.totalorder %s1641_s1, %s1340_s16  ;;  %s18_s13 = int_to_ptr.vmem [resolvable:$true] %s17_s13 }
   0x3   :  { %p1344_p1 = scmp.lt.u32.totalorder %s1340_s16, %s1641_s1 }
   0x5   :  { %p1346_p2 = pnand %p1344_p1, %p1341_p0 }
   0x7   :  { %1349 = shalt.err (!%p1346_p2)
}
   0x8   :  { %s1350_s21 = scalar_lea.vmem %s18_s13, 512  ;;  %p1355_p4 = scmp.lt.s32.totalorder %s18_s13, %s18_s13 }
   0x9   :  { %p1351_p3 = scmp.ne.s32.totalorder %s18_s13, %s1350_s21  ;;  %p1356_p5 = scmp.lt.s32.totalorder %s1350_s21, %s1350_s21 }
   0xb   :  { %p1357_p6 = por %p1356_p5, %p1355_p4 }
   0xd   :  { %p1358_p7 = pnand %p1357_p6, %p1351_p3 }
   0xf   :  { %1361 = shalt.err (!%p1358_p7)
}
  0x10   :  { %s1389_s22 = smov 128   ;;  %s1390_s23 = smov 8  }
  0x11   :  { %23 = dma.hbm_to_vmem [thread:$0]  %s1641_s1, 512, %s18_s13, [#allocation7], %s1389_s22, %s1389_s22, %s1390_s23  }
  0x12   :  { %1384 = dma.done.wait [#allocation7], 512  }
  0x13   :  { %1385 = vsyncadd [#allocation7], 4294966784  ;;  %vm33_vm0 = vcmask 254976   ;;  %v1391_v0 = vmov 0.0|0.0   ;;  %vm1392_vm1 = vmmov 0   ;;  %v1393_v1 = vmov 0.0  }
  0x14   :  { %1229 = vmatprep.subr.bf16.mxu0 %v1391_v0  ;;  %1149 = vmatprep.mubr.msk.f32.mxu0 %vm1392_vm1, %v1393_v1  ;;  %34 = vst.msk [vmem:[#allocation2] sm:$0x3] %vm33_vm0, %v1393_v1  ;;  %35 = vst.msk [vmem:[#allocation3] sm:$0x3] %vm33_vm0, %v1393_v1  ;;  %v1394_v2 = vmov 0   ;;  %v36_v3 = vld [vmem:[#allocation6] sm:$0xff] }
  0x15   :  { %1290 = vset.pattern.permute.xlu0 %v1394_v2  ;;  %1235 = vmatprep.subr.bf16.mxu1 %v1391_v0  ;;  %v37_v4 = vld [vmem:[#allocation6 + $0x8] sm:$0xff]  ;;  %v38_v5 = vld [vmem:[#allocation6 + $0x10] sm:$0xff]  ;;  %v39_v7 = vld [vmem:[#allocation6 + $0x18] sm:$0xff]  ;;  %s1395_s27 = smov 32   ;;  %vm131_vm2 = vcmask 261120   ;;  %s1396_s5 = smov 64  }
  0x16   :  { %1160 = vmatprep.mubr.msk.f32.mxu1 %vm1392_vm1, %v1393_v1  ;;  %1291 = vset.pattern.permute.xlu1 %v1394_v2  ;;  %v1441_v6 = vpack.c.bf16 %v37_v4, %v36_v3  ;;  %v44_v8 = vld [vmem:[%s1640_s0] sm:$0x3]  ;;  %v1447_v10 = vpack.c.bf16 %v39_v7, %v38_v5  ;;  %v45_v34 = vld [vmem:[%s1640_s0 + $0x2] sm:$0x3]  ;;  %v46_v57 = vld [vmem:[%s1640_s0 + $0x4] sm:$0x3] }
  0x17   :  { %54 = vperm.xlu0 %1290, %v44_v8   ;;  %v1467_v12 = vld [vmem:[%s1642_s2] ss:$0 sm:$0xff]  ;;  %v1472_v14 = vld [vmem:[%s1642_s2 + $0x1] ss:$0 sm:$0xff]  ;;  %s1397_s21 = smov 96   ;;  %vm248_vm3 = vcmask 1024  }
  0x18   :  { %1231 = vmatpush3.bf16.msra.mxu0 %v1441_v6  ;;  %1237 = vmatpush3.bf16.msra.mxu1 %v1441_v6  ;;  %vm361_vm4 = vcmask 9224   ;;  %vm474_vm5 = vcmask 17424   ;;  %vm587_vm6 = vcmask 25624   ;;  %vm700_vm7 = vcmask 33824   ;;  %s1398_s24 = smov [#allocation9]  }
  0x19   :  { %1232 = vmatprep.subr.bf16.mxu0 %v1391_v0  ;;  %1238 = vmatprep.subr.bf16.mxu1 %v1391_v0  ;;  %vm813_vm8 = vcmask 42024   ;;  %vm926_vm9 = vcmask 50224   ;;  %vm1039_vm10 = vcmask 58424   ;;  %s1065_s25 = sshll.u32 %s1398_s24, 4  ;;  %vm1057_vm11 = vcmask 58368   ;;  %s1066_s25 = int_to_ptr.vmem [resolvable:$true] %s1065_s25 }
  0x1a   :  { %s1362_s1 = scalar_lea.vmem %s1066_s25, 32  ;;  %p1367_p9 = scmp.lt.s32.totalorder %s1066_s25, %s1066_s25 }
  0x1b   :  { %v129_v9 = vld [vmem:[#allocation3] sm:$0x3]  ;;  %v128_v11 = vld [vmem:[#allocation2] sm:$0x3]  ;;  %p1363_p8 = scmp.ne.s32.totalorder %s1066_s25, %s1362_s1  ;;  %p1368_p10 = scmp.lt.s32.totalorder %s1362_s1, %s1362_s1 }
  0x1c   :  { %215 = vrot.lane.b32.xlu1 %v129_v9, %s1395_s27  ;;  %1234 = vmatpush3.bf16.msra.mxu0 %v1447_v10 }
  0x1d   :  { %1240 = vmatpush3.bf16.msra.mxu1 %v1447_v10  ;;  %1241 = vmatprep.subr.bf16.mxu0 %v1391_v0  ;;  %p1369_p11 = por %p1368_p10, %p1367_p9 }
  0x1e   :  { %1247 = vmatprep.subr.bf16.mxu1 %v1391_v0 }
  0x1f   :  { %1150 = vmatmul.mubr.msk.f32.vlgmr.msra.gmra.mrb[0].mxu0 %vm131_vm2, %v128_v11  ;;  %p1370_p12 = pnand %p1369_p11, %p1363_p8 }
  0x20   :  { %1243 = vmatpush3.bf16.msra.mxu0 %v1441_v6  ;;  %1171 = vmatprep.mubr.msk.f32.mxu0 %vm1392_vm1, %v1393_v1 }
  0x21   :  { %1244 = vmatprep.subr.bf16.mxu0 %v1391_v0 }
  0x24   :  { %1246 = vmatpush3.bf16.msra.mxu0 %v1447_v10 }
  0x25   :  { %1253 = vmatprep.subr.bf16.mxu0 %v1391_v0 }
  0x8e   :  { %v216_v29 = vpop.permute.xlu1 %215 }
  0x96   :  { %v55_v13 = vpop.permute.xlu0 %54 }
  0x97   :  { %v96_v15 = vmul.f32 %v1467_v12, %v55_v13 }
  0x99   :  { %v108_v16 = vadd.f32 %v1472_v14, %v96_v15 }
  0x9b   :  { %116 = vst [vmem:[#allocation4] sm:$0x3] %v108_v16 }
  0xa2   :  { %v130_v17 = vld [vmem:[#allocation4] sm:$0x3] }
  0xf2   :  { %v201_v18 = vpop.f32.mrb[0].mxu0 }
  0xf3   :  { %v205_v19 = vadd.f32 %v201_v18, %v130_v17  ;;  %v1151_v20 = vpop.f32.mrb[1].mxu0 }
  0xf5   :  { %v1078_v21 = vmul.f32 -1.442695, %v205_v19 }
  0xf7   :  { %1292 = vpow2.f32 %v1078_v21 }
 0x101   :  { %v1293_v22 = vpop.eup %1292 }
 0x102   :  { %v209_v23 = vadd.f32 1.0, %v1293_v22  ;;  %v47_v22 = vld [vmem:[%s1640_s0 + $0x6] sm:$0x3] }
 0x104   :  { %1294 = vrcp.f32 %v209_v23 }
 0x10e   :  { %v1295_v24 = vpop.eup %1294 }
 0x10f   :  { %v212_v25 = vmul.f32 2.0, %v1295_v24  ;;  %v218_v30 = vmul.f32 %v1295_v24, %v216_v29 }
 0x111   :  { %v1079_v26 = vadd.f32 -1.0, %v212_v25 }
 0x113   :  { %220 = vrot.lane.b32.xlu0 %v1079_v26, %s1396_s5 }
 0x185   :  { %v221_v27 = vpop.permute.xlu0 %220 }
 0x186   :  { %v223_v28 = vmul.f32 %v1295_v24, %v221_v27 }
 0x188   :  { %225 = vrot.lane.b32.xlu1 %v223_v28, %s1395_s27 }
 0x1fa   :  { %v226_v31 = vpop.permute.xlu1 %225 }
 0x1fb   :  { %v228_v32 = vadd.f32 %v226_v31, %v218_v30 }
 0x1fd   :  { %1296 = vtanh.f32 %v228_v32 }
 0x207   :  { %v1297_v33 = vpop.eup %1296 }
 0x208   :  { %231 = vrot.lane.b32.xlu0 %v1297_v33, %s1396_s5 }
 0x20c   :  { %59 = vperm.xlu0 %1290, %v45_v34  }
 0x27a   :  { %v232_v35 = vpop.permute.xlu0 %231 }
 0x27b   :  { %v1482_v36 = vmul.f32 %v1295_v24, %v232_v35 }
 0x27d   :  { %253 = vrot.lane.b32.xlu1 %v1482_v36, %s1395_s27 }
 0x28b   :  { %v60_v37 = vpop.permute.xlu0 %59 }
 0x28c   :  { %v97_v38 = vmul.f32 %v1467_v12, %v60_v37 }
 0x28e   :  { %v109_v39 = vadd.f32 %v1472_v14, %v97_v38 }
 0x290   :  { %117 = vst [vmem:[#allocation4 + $0x2] sm:$0x3] %v109_v39 }
 0x297   :  { %v251_v41 = vld [vmem:[#allocation4 + $0x2] sm:$0x3] }
 0x2ef   :  { %v254_v40 = vpop.permute.xlu1 %253 }
 0x2f0   :  { %1161 = vmatmul.mubr.msk.f32.vlgmr.msra.gmra.mrb[0].mxu1 %vm131_vm2, %v254_v40 }
 0x2f1   :  { %1249 = vmatpush3.bf16.msra.mxu1 %v1441_v6  ;;  %1182 = vmatprep.mubr.msk.f32.mxu1 %vm1392_vm1, %v1393_v1 }
 0x2f2   :  { %1250 = vmatprep.subr.bf16.mxu1 %v1391_v0 }
 0x2f5   :  { %1252 = vmatpush3.bf16.msra.mxu1 %v1447_v10 }
 0x2f6   :  { %1259 = vmatprep.subr.bf16.mxu1 %v1391_v0 }
 0x3c3   :  { %v323_v42 = vpop.f32.mrb[0].mxu1 }
 0x3c4   :  { %v327_v43 = vadd.f32 %v323_v42, %v251_v41  ;;  %v1162_v44 = vpop.f32.mrb[1].mxu1 }
 0x3c6   :  { %v1081_v45 = vmul.f32 -1.442695, %v327_v43 }
 0x3c8   :  { %1298 = vpow2.f32 %v1081_v45 }
 0x3d2   :  { %v1299_v46 = vpop.eup %1298 }
 0x3d3   :  { %v331_v47 = vadd.f32 1.0, %v1299_v46  ;;  %v48_v46 = vld [vmem:[%s1640_s0 + $0x8] sm:$0x3] }
 0x3d5   :  { %1300 = vrcp.f32 %v331_v47 }
 0x3df   :  { %v1301_v48 = vpop.eup %1300 }
 0x3e0   :  { %v334_v49 = vmul.f32 2.0, %v1301_v48  ;;  %v336_v53 = vmul.f32 %v1301_v48, %v228_v32 }
 0x3e2   :  { %v1082_v50 = vadd.f32 -1.0, %v334_v49 }
 0x3e4   :  { %338 = vrot.lane.b32.xlu1 %v1082_v50, %s1396_s5 }
 0x456   :  { %v339_v51 = vpop.permute.xlu1 %338 }
 0x457   :  { %v341_v52 = vmul.f32 %v1301_v48, %v339_v51 }
 0x459   :  { %343 = vrot.lane.b32.xlu0 %v341_v52, %s1395_s27 }
 0x4cb   :  { %v344_v54 = vpop.permute.xlu0 %343 }
 0x4cc   :  { %v346_v55 = vadd.f32 %v344_v54, %v336_v53 }
 0x4ce   :  { %1302 = vtanh.f32 %v346_v55 }
 0x4d8   :  { %v1303_v56 = vpop.eup %1302 }
 0x4d9   :  { %349 = vrot.lane.b32.xlu1 %v1303_v56, %s1396_s5 }
 0x4dd   :  { %64 = vperm.xlu1 %1291, %v46_v57  }
 0x54b   :  { %v350_v58 = vpop.permute.xlu1 %349 }
 0x54c   :  { %v1501_v59 = vmul.f32 %v1301_v48, %v350_v58 }
 0x54e   :  { %366 = vrot.lane.b32.xlu0 %v1501_v59, %s1395_s27 }
 0x55c   :  { %v65_v61 = vpop.permute.xlu1 %64 }
 0x55d   :  { %v98_v62 = vmul.f32 %v1467_v12, %v65_v61 }
 0x55f   :  { %v110_v63 = vadd.f32 %v1472_v14, %v98_v62 }
 0x561   :  { %118 = vst [vmem:[#allocation4 + $0x4] sm:$0x3] %v110_v63 }
 0x568   :  { %v364_v2 = vld [vmem:[#allocation4 + $0x4] sm:$0x3] }
 0x5c0   :  { %v367_v60 = vpop.permute.xlu0 %366 }
 0x5c1   :  { %1172 = vmatmul.mubr.msk.f32.vlgmr.msra.gmra.mrb[2].mxu0 %vm131_vm2, %v367_v60 }
 0x5c2   :  { %1255 = vmatpush3.bf16.msra.mxu0 %v1441_v6  ;;  %1193 = vmatprep.mubr.msk.f32.mxu0 %vm1392_vm1, %v1393_v1 }
 0x5c3   :  { %1256 = vmatprep.subr.bf16.mxu0 %v1391_v0 }
 0x5c6   :  { %1258 = vmatpush3.bf16.msra.mxu0 %v1447_v10 }
 0x5c7   :  { %1265 = vmatprep.subr.bf16.mxu0 %v1391_v0 }
 0x694   :  { %v436_v3 = vpop.f32.mrb[2].mxu0 }
 0x695   :  { %v440_v4 = vadd.f32 %v436_v3, %v364_v2  ;;  %v1173_v5 = vpop.f32.mrb[3].mxu0 }
 0x697   :  { %v1084_v7 = vmul.f32 -1.442695, %v440_v4 }
 0x699   :  { %1304 = vpow2.f32 %v1084_v7 }
 0x6a3   :  { %v1305_v8 = vpop.eup %1304 }
 0x6a4   :  { %v444_v9 = vadd.f32 1.0, %v1305_v8 }
 0x6a6   :  { %1306 = vrcp.f32 %v444_v9  ;;  %v49_v9 = vld [vmem:[%s1640_s0 + $0xa] sm:$0x3] }
 0x6b0   :  { %v1307_v11 = vpop.eup %1306 }
 0x6b1   :  { %v447_v13 = vmul.f32 2.0, %v1307_v11  ;;  %v449_v18 = vmul.f32 %v1307_v11, %v346_v55 }
 0x6b3   :  { %v1085_v15 = vadd.f32 -1.0, %v447_v13 }
 0x6b5   :  { %451 = vrot.lane.b32.xlu0 %v1085_v15, %s1396_s5 }
 0x727   :  { %v452_v16 = vpop.permute.xlu0 %451 }
 0x728   :  { %v454_v17 = vmul.f32 %v1307_v11, %v452_v16 }
 0x72a   :  { %456 = vrot.lane.b32.xlu1 %v454_v17, %s1395_s27 }
 0x79c   :  { %v457_v19 = vpop.permute.xlu1 %456 }
 0x79d   :  { %v459_v20 = vadd.f32 %v457_v19, %v449_v18 }
 0x79f   :  { %1308 = vtanh.f32 %v459_v20 }
 0x7a9   :  { %v1309_v21 = vpop.eup %1308 }
 0x7aa   :  { %462 = vrot.lane.b32.xlu0 %v1309_v21, %s1396_s5 }
 0x7ae   :  { %69 = vperm.xlu0 %1290, %v47_v22  }
 0x81c   :  { %v463_v23 = vpop.permute.xlu0 %462 }
 0x81d   :  { %v1520_v24 = vmul.f32 %v1307_v11, %v463_v23 }
 0x81f   :  { %479 = vrot.lane.b32.xlu1 %v1520_v24, %s1395_s27 }
 0x82d   :  { %v70_v25 = vpop.permute.xlu0 %69 }
 0x82e   :  { %v99_v26 = vmul.f32 %v1467_v12, %v70_v25 }
 0x830   :  { %v111_v27 = vadd.f32 %v1472_v14, %v99_v26 }
 0x832   :  { %119 = vst [vmem:[#allocation4 + $0x6] sm:$0x3] %v111_v27 }
 0x839   :  { %v477_v29 = vld [vmem:[#allocation4 + $0x6] sm:$0x3] }
 0x891   :  { %v480_v28 = vpop.permute.xlu1 %479 }
 0x892   :  { %1183 = vmatmul.mubr.msk.f32.vlgmr.msra.gmra.mrb[2].mxu1 %vm131_vm2, %v480_v28 }
 0x893   :  { %1261 = vmatpush3.bf16.msra.mxu1 %v1441_v6  ;;  %1204 = vmatprep.mubr.msk.f32.mxu1 %vm1392_vm1, %v1393_v1 }
 0x894   :  { %1262 = vmatprep.subr.bf16.mxu1 %v1391_v0 }
 0x897   :  { %1264 = vmatpush3.bf16.msra.mxu1 %v1447_v10 }
 0x898   :  { %1271 = vmatprep.subr.bf16.mxu1 %v1391_v0 }
 0x965   :  { %v549_v30 = vpop.f32.mrb[2].mxu1 }
 0x966   :  { %v553_v31 = vadd.f32 %v549_v30, %v477_v29  ;;  %v1184_v32 = vpop.f32.mrb[3].mxu1 }
 0x967   :  { %v50_v32 = vld [vmem:[%s1640_s0 + $0xc] sm:$0x3] }
 0x968   :  { %v1087_v33 = vmul.f32 -1.442695, %v553_v31 }
 0x96a   :  { %1310 = vpow2.f32 %v1087_v33 }
 0x974   :  { %v1311_v34 = vpop.eup %1310 }
 0x975   :  { %v557_v35 = vadd.f32 1.0, %v1311_v34 }
 0x977   :  { %1312 = vrcp.f32 %v557_v35 }
 0x981   :  { %v1313_v37 = vpop.eup %1312 }
 0x982   :  { %v560_v38 = vmul.f32 2.0, %v1313_v37  ;;  %v562_v42 = vmul.f32 %v1313_v37, %v459_v20 }
 0x984   :  { %v1088_v39 = vadd.f32 -1.0, %v560_v38 }
 0x986   :  { %564 = vrot.lane.b32.xlu1 %v1088_v39, %s1396_s5 }
 0x9f8   :  { %v565_v40 = vpop.permute.xlu1 %564 }
 0x9f9   :  { %v567_v41 = vmul.f32 %v1313_v37, %v565_v40 }
 0x9fb   :  { %569 = vrot.lane.b32.xlu0 %v567_v41, %s1395_s27 }
 0xa6d   :  { %v570_v43 = vpop.permute.xlu0 %569 }
 0xa6e   :  { %v572_v44 = vadd.f32 %v570_v43, %v562_v42 }
 0xa70   :  { %1314 = vtanh.f32 %v572_v44 }
 0xa7a   :  { %v1315_v45 = vpop.eup %1314 }
 0xa7b   :  { %575 = vrot.lane.b32.xlu1 %v1315_v45, %s1396_s5 }
 0xa7f   :  { %74 = vperm.xlu1 %1291, %v48_v46  }
 0xaed   :  { %v576_v47 = vpop.permute.xlu1 %575 }
 0xaee   :  { %v1539_v48 = vmul.f32 %v1313_v37, %v576_v47 }
 0xaf0   :  { %592 = vrot.lane.b32.xlu0 %v1539_v48, %s1395_s27 }
 0xafe   :  { %v75_v49 = vpop.permute.xlu1 %74 }
 0xaff   :  { %v100_v50 = vmul.f32 %v1467_v12, %v75_v49 }
 0xb01   :  { %v112_v51 = vadd.f32 %v1472_v14, %v100_v50 }
 0xb03   :  { %120 = vst [vmem:[#allocation4 + $0x8] sm:$0x3] %v112_v51 }
 0xb0a   :  { %v590_v53 = vld [vmem:[#allocation4 + $0x8] sm:$0x3] }
 0xb62   :  { %v593_v52 = vpop.permute.xlu0 %592 }
 0xb63   :  { %1194 = vmatmul.mubr.msk.f32.vlgmr.msra.gmra.mrb[4].mxu0 %vm131_vm2, %v593_v52 }
 0xb64   :  { %1267 = vmatpush3.bf16.msra.mxu0 %v1441_v6  ;;  %1215 = vmatprep.mubr.msk.f32.mxu0 %vm1392_vm1, %v1393_v1 }
 0xb65   :  { %1268 = vmatprep.subr.bf16.mxu0 %v1391_v0 }
 0xb68   :  { %1270 = vmatpush3.bf16.msra.mxu0 %v1447_v10 }
 0xc36   :  { %v662_v54 = vpop.f32.mrb[4].mxu0 }
 0xc37   :  { %v666_v55 = vadd.f32 %v662_v54, %v590_v53  ;;  %v1195_v56 = vpop.f32.mrb[5].mxu0 }
 0xc39   :  { %v1090_v57 = vmul.f32 -1.442695, %v666_v55 }
 0xc3b   :  { %1316 = vpow2.f32 %v1090_v57  ;;  %v51_v57 = vld [vmem:[%s1640_s0 + $0xe] sm:$0x3] }
 0xc45   :  { %v1317_v58 = vpop.eup %1316 }
 0xc46   :  { %v670_v60 = vadd.f32 1.0, %v1317_v58 }
 0xc48   :  { %1318 = vrcp.f32 %v670_v60 }
 0xc52   :  { %v1319_v61 = vpop.eup %1318 }
 0xc53   :  { %v673_v62 = vmul.f32 2.0, %v1319_v61  ;;  %v675_v4 = vmul.f32 %v1319_v61, %v572_v44 }
 0xc55   :  { %v1091_v63 = vadd.f32 -1.0, %v673_v62 }
 0xc57   :  { %677 = vrot.lane.b32.xlu0 %v1091_v63, %s1396_s5 }
 0xcc9   :  { %v678_v2 = vpop.permute.xlu0 %677 }
 0xcca   :  { %v680_v3 = vmul.f32 %v1319_v61, %v678_v2 }
 0xccc   :  { %682 = vrot.lane.b32.xlu1 %v680_v3, %s1395_s27 }
 0xd3e   :  { %v683_v5 = vpop.permute.xlu1 %682 }
 0xd3f   :  { %v685_v7 = vadd.f32 %v683_v5, %v675_v4 }
 0xd41   :  { %1320 = vtanh.f32 %v685_v7 }
 0xd4b   :  { %v1321_v8 = vpop.eup %1320 }
 0xd4c   :  { %688 = vrot.lane.b32.xlu0 %v1321_v8, %s1396_s5 }
 0xd50   :  { %79 = vperm.xlu0 %1290, %v49_v9  }
 0xdbe   :  { %v689_v11 = vpop.permute.xlu0 %688 }
 0xdbf   :  { %v1557_v13 = vmul.f32 %v1319_v61, %v689_v11 }
 0xdc1   :  { %705 = vrot.lane.b32.xlu1 %v1557_v13, %s1395_s27 }
 0xdcf   :  { %v80_v15 = vpop.permute.xlu0 %79 }
 0xdd0   :  { %v101_v16 = vmul.f32 %v1467_v12, %v80_v15 }
 0xdd2   :  { %v113_v17 = vadd.f32 %v1472_v14, %v101_v16 }
 0xdd4   :  { %121 = vst [vmem:[#allocation4 + $0xa] sm:$0x3] %v113_v17 }
 0xddb   :  { %v703_v19 = vld [vmem:[#allocation4 + $0xa] sm:$0x3] }
 0xe33   :  { %v706_v18 = vpop.permute.xlu1 %705 }
 0xe34   :  { %1205 = vmatmul.mubr.msk.f32.vlgmr.msra.gmra.mrb[4].mxu1 %vm131_vm2, %v706_v18 }
 0xe35   :  { %1273 = vmatpush3.bf16.msra.mxu1 %v1441_v6  ;;  %1226 = vmatprep.mubr.msk.f32.mxu1 %vm1392_vm1, %v1393_v1 }
 0xe36   :  { %1274 = vmatprep.subr.bf16.mxu1 %v1391_v0 }
 0xe39   :  { %1276 = vmatpush3.bf16.msra.mxu1 %v1447_v10 }
 0xf07   :  { %v775_v20 = vpop.f32.mrb[4].mxu1 }
 0xf08   :  { %v779_v21 = vadd.f32 %v775_v20, %v703_v19  ;;  %v1206_v22 = vpop.f32.mrb[5].mxu1 }
 0xf0a   :  { %v1093_v23 = vmul.f32 -1.442695, %v779_v21 }
 0xf0c   :  { %1322 = vpow2.f32 %v1093_v23 }
 0xf16   :  { %v1323_v25 = vpop.eup %1322 }
 0xf17   :  { %v783_v26 = vadd.f32 1.0, %v1323_v25 }
 0xf19   :  { %1324 = vrcp.f32 %v783_v26 }
 0xf23   :  { %v1325_v27 = vpop.eup %1324 }
 0xf24   :  { %v786_v28 = vmul.f32 2.0, %v1325_v27  ;;  %v788_v0 = vmul.f32 %v1325_v27, %v685_v7 }
 0xf26   :  { %v1094_v29 = vadd.f32 -1.0, %v786_v28 }
 0xf28   :  { %790 = vrot.lane.b32.xlu1 %v1094_v29, %s1396_s5 }
 0xf9a   :  { %v791_v6 = vpop.permute.xlu1 %790 }
 0xf9b   :  { %v793_v1 = vmul.f32 %v1325_v27, %v791_v6 }
 0xf9d   :  { %795 = vrot.lane.b32.xlu0 %v793_v1, %s1395_s27 }
0x100f   :  { %v796_v10 = vpop.permute.xlu0 %795 }
0x1010   :  { %v798_v30 = vadd.f32 %v796_v10, %v788_v0 }
0x1012   :  { %1326 = vtanh.f32 %v798_v30 }
0x101c   :  { %v1327_v31 = vpop.eup %1326 }
0x101d   :  { %801 = vrot.lane.b32.xlu1 %v1327_v31, %s1396_s5 }
0x1021   :  { %84 = vperm.xlu1 %1291, %v50_v32  }
0x108f   :  { %v802_v33 = vpop.permute.xlu1 %801 }
0x1090   :  { %v1575_v34 = vmul.f32 %v1325_v27, %v802_v33 }
0x1092   :  { %818 = vrot.lane.b32.xlu0 %v1575_v34, %s1395_s27 }
0x10a0   :  { %v85_v35 = vpop.permute.xlu1 %84 }
0x10a1   :  { %v102_v37 = vmul.f32 %v1467_v12, %v85_v35 }
0x10a3   :  { %v114_v38 = vadd.f32 %v1472_v14, %v102_v37 }
0x10a5   :  { %122 = vst [vmem:[#allocation4 + $0xc] sm:$0x3] %v114_v38 }
0x10ac   :  { %v816_v40 = vld [vmem:[#allocation4 + $0xc] sm:$0x3] }
0x1104   :  { %v819_v39 = vpop.permute.xlu0 %818 }
0x1105   :  { %1216 = vmatmul.mubr.msk.f32.vlgmr.msra.gmra.mrb[6].mxu0 %vm131_vm2, %v819_v39 }
0x11d8   :  { %v888_v41 = vpop.f32.mrb[6].mxu0 }
0x11d9   :  { %v892_v42 = vadd.f32 %v888_v41, %v816_v40  ;;  %v1217_v43 = vpop.f32.mrb[7].mxu0  ;;  %v43_v41 = vld [vmem:[%s1642_s2 + $0x3] sm:$0x1] }
0x11da   :  { %1277 = vpush %v43_v41 }
0x11db   :  { %v1096_v44 = vmul.f32 -1.442695, %v892_v42 }
0x11dd   :  { %1328 = vpow2.f32 %v1096_v44 }
0x11e7   :  { %v1329_v45 = vpop.eup %1328 }
0x11e8   :  { %v896_v46 = vadd.f32 1.0, %v1329_v45 }
0x11ea   :  { %1330 = vrcp.f32 %v896_v46 }
0x11f4   :  { %v1331_v47 = vpop.eup %1330 }
0x11f5   :  { %v899_v49 = vmul.f32 2.0, %v1331_v47  ;;  %v901_v53 = vmul.f32 %v1331_v47, %v798_v30 }
0x11f7   :  { %v1097_v50 = vadd.f32 -1.0, %v899_v49 }
0x11f9   :  { %903 = vrot.lane.b32.xlu0 %v1097_v50, %s1396_s5 }
0x126b   :  { %v904_v51 = vpop.permute.xlu0 %903 }
0x126c   :  { %v906_v52 = vmul.f32 %v1331_v47, %v904_v51 }
0x126e   :  { %908 = vrot.lane.b32.xlu1 %v906_v52, %s1395_s27 }
0x12e0   :  { %v909_v54 = vpop.permute.xlu1 %908 }
0x12e1   :  { %v911_v55 = vadd.f32 %v909_v54, %v901_v53 }
0x12e3   :  { %1332 = vtanh.f32 %v911_v55 }
0x12ed   :  { %v1333_v56 = vpop.eup %1332 }
0x12ee   :  { %914 = vrot.lane.b32.xlu0 %v1333_v56, %s1396_s5 }
0x12f2   :  { %89 = vperm.xlu0 %1290, %v51_v57  }
0x1360   :  { %v915_v58 = vpop.permute.xlu0 %914 }
0x1361   :  { %v917_v60 = vmul.f32 %v1331_v47, %v915_v58 }
0x1363   :  { %931 = vrot.lane.b32.xlu1 %v917_v60, %s1395_s27 }
0x1371   :  { %v90_v61 = vpop.permute.xlu0 %89 }
0x1372   :  { %v103_v62 = vmul.f32 %v1467_v12, %v90_v61  ;;  %v1076_v12 = vld [vmem:[%s1642_s2 + $0x2] ss:$0 sm:$0xff]  ;;  %s1278_s2 = spop %1277 }
0x1374   :  { %v115_v63 = vadd.f32 %v1472_v14, %v103_v62 }
0x1376   :  { %123 = vst [vmem:[#allocation4 + $0xe] sm:$0x3] %v115_v63 }
0x137d   :  { %v929_v3 = vld [vmem:[#allocation4 + $0xe] sm:$0x3] }
0x13d5   :  { %v932_v2 = vpop.permute.xlu1 %931 }
0x13d6   :  { %1227 = vmatmul.mubr.msk.f32.vlgmr.msra.gmra.mrb[6].mxu1 %vm131_vm2, %v932_v2 }
0x14a9   :  { %v1001_v4 = vpop.f32.mrb[6].mxu1 }
0x14aa   :  { %v1005_v5 = vadd.f32 %v1001_v4, %v929_v3  ;;  %v1228_v7 = vpop.f32.mrb[7].mxu1 }
0x14ac   :  { %v1099_v8 = vmul.f32 -1.442695, %v1005_v5 }
0x14ae   :  { %1334 = vpow2.f32 %v1099_v8 }
0x14b8   :  { %v1335_v9 = vpop.eup %1334 }
0x14b9   :  { %v1009_v11 = vadd.f32 1.0, %v1335_v9 }
0x14bb   :  { %1336 = vrcp.f32 %v1009_v11 }
0x14c5   :  { %v1337_v15 = vpop.eup %1336 }
0x14c6   :  { %v1012_v16 = vmul.f32 2.0, %v1337_v15  ;;  %v1014_v21 = vmul.f32 %v1337_v15, %v911_v55  ;;  %v1054_v55 = vstv %s1278_s2 }
0x14c8   :  { %v1100_v17 = vadd.f32 -1.0, %v1012_v16 }
0x14ca   :  { %1016 = vrot.lane.b32.xlu1 %v1100_v17, %s1396_s5 }
0x14ce   :  { %236 = vrot.lane.b32.xlu1 %v1076_v12, %s1397_s21 }
0x153c   :  { %v1017_v14 = vpop.permute.xlu1 %1016 }
0x153d   :  { %v1019_v18 = vmul.f32 %v1337_v15, %v1017_v14 }
0x153f   :  { %1021 = vrot.lane.b32.xlu0 %v1019_v18, %s1395_s27 }
0x1540   :  { %v237_v19 = vpop.permute.xlu1 %236 }
0x1541   :  { %v239_v20 = vmul.f32 %v237_v19, %v1482_v36  ;;  %v353_v28 = vmul.f32 %v1501_v59, %v237_v19  ;;  %v466_v29 = vmul.f32 %v1520_v24, %v237_v19  ;;  %v692_v36 = vmul.f32 %v1557_v13, %v237_v19 }
0x1542   :  { %v805_v6 = vmul.f32 %v1575_v34, %v237_v19  ;;  %v918_v1 = vmul.f32 %v917_v60, %v237_v19  ;;  %v579_v35 = vmul.f32 %v1539_v48, %v237_v19 }
0x1543   :  { %241 = vrot.lane.b32.xlu0 %v239_v20, %s1395_s27 }
0x15b1   :  { %v1022_v22 = vpop.permute.xlu0 %1021 }
0x15b2   :  { %v1024_v23 = vadd.f32 %v1022_v22, %v1014_v21 }
0x15b4   :  { %1338 = vtanh.f32 %v1024_v23 }
0x15b5   :  { %v242_v25 = vpop.permute.xlu0 %241 }
0x15b6   :  { %v245_v26 = vsel %vm33_vm0, %v242_v25, 0.0 }
0x15b7   :  { %246 = vadd.xlane.f32.xlu1 %v245_v26 }
0x15be   :  { %v1339_v27 = vpop.eup %1338 }
0x15bf   :  { %1027 = vrot.lane.b32.xlu0 %v1339_v27, %s1396_s5 }
0x15c3   :  { %355 = vrot.lane.b32.xlu0 %v353_v28, %s1395_s27 }
0x15c8   :  { %468 = vrot.lane.b32.xlu1 %v466_v29, %s1395_s27 }
0x15cc   :  { %694 = vrot.lane.b32.xlu1 %v692_v36, %s1395_s27 }
0x15d0   :  { %807 = vrot.lane.b32.xlu1 %v805_v6, %s1395_s27 }
0x15d4   :  { %920 = vrot.lane.b32.xlu1 %v918_v1, %s1395_s27 }
0x1631   :  { %v1028_v0 = vpop.permute.xlu0 %1027 }
0x1632   :  { %v1030_v10 = vmul.f32 %v1337_v15, %v1028_v0 }
0x1634   :  { %v1031_v59 = vmul.f32 %v1030_v10, %v237_v19 }
0x1635   :  { %v356_v30 = vpop.permute.xlu0 %355 }
0x1636   :  { %1033 = vrot.lane.b32.xlu1 %v1031_v59, %s1395_s27  ;;  %v358_v24 = vsel %vm33_vm0, %v356_v30, 0.0 }
0x1637   :  { %359 = vadd.xlane.f32.xlu0 %v358_v24 }
0x1644   :  { %v247_v13 = vpop.xlane.xlu1 %246 }
0x1645   :  { %249 = vst.msk [vmem:[#allocation5] sm:$0x3] %vm248_vm3, %v247_v13 }
0x1648   :  { %v469_v31 = vpop.permute.xlu1 %468 }
0x1649   :  { %v471_v32 = vsel %vm33_vm0, %v469_v31, 0.0 }
0x164a   :  { %472 = vadd.xlane.f32.xlu0 %v471_v32 }
0x164c   :  { %v695_v33 = vpop.permute.xlu1 %694 }
0x164d   :  { %v697_v34 = vsel %vm33_vm0, %v695_v33, 0.0 }
0x1650   :  { %v808_v37 = vpop.permute.xlu1 %807 }
0x1651   :  { %v810_v45 = vsel %vm33_vm0, %v808_v37, 0.0 }
0x1654   :  { %v921_v38 = vpop.permute.xlu1 %920 }
0x1655   :  { %v923_v46 = vsel %vm33_vm0, %v921_v38, 0.0 }
0x165a   :  { %698 = vadd.xlane.f32.xlu1 %v697_v34 }
0x1660   :  { %581 = vrot.lane.b32.xlu0 %v579_v35, %s1395_s27 }
0x16a8   :  { %v1034_v39 = vpop.permute.xlu1 %1033 }
0x16a9   :  { %v1036_v40 = vsel %vm33_vm0, %v1034_v39, 0.0 }
0x16aa   :  { %1037 = vadd.xlane.f32.xlu1 %v1036_v40 }
0x16bb   :  { %1047 = vrot.lane.b32.xlu1 %v1024_v23, %s1397_s21 }
0x16c4   :  { %v360_v42 = vpop.xlane.xlu0 %359 }
0x16c5   :  { %362 = vst.msk [vmem:[#allocation5] sm:$0x3] %vm361_vm4, %v360_v42 }
0x16d7   :  { %v473_v48 = vpop.xlane.xlu0 %472 }
0x16d8   :  { %475 = vst.msk [vmem:[#allocation5] sm:$0x3] %vm474_vm5, %v473_v48 }
0x16db   :  { %v582_v43 = vpop.permute.xlu0 %581 }
0x16dc   :  { %v584_v44 = vsel %vm33_vm0, %v582_v43, 0.0 }
0x16dd   :  { %585 = vadd.xlane.f32.xlu0 %v584_v44 }
0x16e1   :  { %811 = vadd.xlane.f32.xlu0 %v810_v45 }
0x16e5   :  { %924 = vadd.xlane.f32.xlu0 %v923_v46 }
0x16e7   :  { %v699_v47 = vpop.xlane.xlu1 %698 }
0x16fb   :  { %1042 = vrot.lane.b32.xlu0 %v1030_v10, %s1395_s27 }
0x1737   :  { %v1038_v49 = vpop.xlane.xlu1 %1037 }
0x173b   :  { %v1048_v50 = vpop.permute.xlu1 %1047 }
0x173c   :  { %1050 = vst.msk [vmem:[#allocation3] sm:$0x3] %vm33_vm0, %v1048_v50 }
0x176a   :  { %v586_v51 = vpop.xlane.xlu0 %585 }
0x176b   :  { %588 = vst.msk [vmem:[#allocation5] sm:$0x3] %vm587_vm6, %v586_v51 }
0x176c   :  { %701 = vst.msk [vmem:[#allocation5] sm:$0x3] %vm700_vm7, %v699_v47 }
0x176e   :  { %v812_v52 = vpop.xlane.xlu0 %811 }
0x176f   :  { %814 = vst.msk [vmem:[#allocation5] sm:$0x3] %vm813_vm8, %v812_v52 }
0x1772   :  { %v925_v53 = vpop.xlane.xlu0 %924 }
0x1773   :  { %927 = vst.msk [vmem:[#allocation5] sm:$0x3] %vm926_vm9, %v925_v53 }
0x1774   :  { %1040 = vst.msk [vmem:[#allocation5] sm:$0x3] %vm1039_vm10, %v1038_v49 }
0x1776   :  { %v1043_v54 = vpop.permute.xlu0 %1042 }
0x1777   :  { %1045 = vst.msk [vmem:[#allocation2] sm:$0x3] %vm33_vm0, %v1043_v54 }
0x177b   :  { %v1051_v56 = vld [vmem:[#allocation5] sm:$0x3] }
0x177c   :  { %v1056_v57 = vadd.f32 %v1054_v55, %v1051_v56 }
0x177e   :  { %1058 = vst.msk [vmem:[#allocation9] sm:$0x3] %vm1057_vm11, %v1056_v57 }
0x177f   :  { %1373 = shalt.err (!%p1370_p12)
}
0x1780   :  { %s1374_s28 = scalar_lea.hbm %s1643_s3, 32 }
0x1781   :  { %p1375_p13 = scmp.ne.s32.totalorder %s1643_s3, %s1374_s28  ;;  %p1378_p0 = scmp.lt.u32.totalorder %s1374_s28, %s1643_s3 }
0x1783   :  { %p1380_p1 = pnand %p1378_p0, %p1375_p13 }
0x1785   :  { %1383 = shalt.err (!%p1380_p1)
}
0x1786   :  { %1068 = dma.vmem_to_hbm [thread:$0]  %s1066_s25, 32, %s1643_s3, [#allocation8]  }
0x1787   :  { %1386 = dma.done.wait [#allocation8], 32  }
0x1788   :  { %1387 = vsyncadd [#allocation8], 4294967264 }
0x1789   :  { %1072 = vsyncpa [#allocation7], 1 }
0x178a   :  { %1073 = vsyncpa [#allocation8], 1 }

</bundles_post_ra>
